<compile_context>
chip_gen: v5e
topology: v5e:2x2
jax: 0.10.0
libtpu: 0.0.40
codegen_flags: <defaults>
</compile_context>

<pallas_src>
import jax
import jax.numpy as jnp
from jax.experimental import pallas as pl
from jax.experimental.pallas import tpu as pltpu


def _round_up(x, m):
    return (x + m - 1) // m * m


def _round_down(x, m):
    return x // m * m


def netflix_kernel(x_ref, w1_ref, b1_ref, w2_ref, b2_ref, out_ref):
    # x_ref  : (TB, K)  VMEM, batch tile (double-buffered by the pipeline)
    # w1_ref : (K, H)   VMEM, resident across the whole grid
    # b1_ref : (1, H)   VMEM, resident
    # w2_ref : (8, H)   VMEM, resident (8 identical copies of fc2's weight row)
    # b2_ref : (1,)     SMEM scalar
    # out_ref: (1, TB)  VMEM, lane-dense output row for this batch tile
    h = jnp.dot(x_ref[...], w1_ref[...], preferred_element_type=jnp.float32)
    h = jnp.maximum(h + b1_ref[...], 0.0)                        # (TB, H)

    # fc2 as a contraction over the hidden dim of BOTH operands (q.k^T style)
    # so each row's result lands in the lane dimension -> lane-dense store.
    y8 = jax.lax.dot_general(
        w2_ref[...], h,
        dimension_numbers=(((1,), (1,)), ((), ())),
        preferred_element_type=jnp.float32)                      # (8, TB)
    y = y8[0:1, :] + b2_ref[0]                                   # (1, TB)
    out_ref[...] = jax.nn.sigmoid(y).astype(out_ref.dtype)


def _pick_batch_tile(B, K, H):
    """Bytes-based batch tile, capped by a v7x-safe VMEM budget."""
    X_TILE_TARGET = 8 << 20   # ~8 MiB of x per tile: DMA time >> 0.35us step cost
    VMEM_BUDGET = 44 << 20    # comfortably under v7x's 64 MiB physical VMEM

    if B <= 128:
        # Single block equal to the full array: no padding / masking at all.
        return B

    bytes_per_row = 4 * K
    # VMEM that scales with the tile: double-buffered x, the (TB, H) f32
    # hidden activation, the (8, TB) fc2 result, double-buffered (1, TB) out.
    vmem_per_row = 2 * bytes_per_row + 4 * H + 4 * 8 + 2 * 4
    fixed_vmem = 4 * (K * H + H + 8 * H) + (2 << 20)  # weights + headroom

    tb = X_TILE_TARGET // bytes_per_row
    tb = min(tb, max(128, (VMEM_BUDGET - fixed_vmem) // vmem_per_row))
    tb = min(tb, B)
    tb = max(128, _round_down(tb, 128))

    # v7x megacore: make sure the "parallel" batch axis has >= 2 tiles so both
    # TensorCores get work (negligible extra cost on single-core v5e/v6e).
    if pl.cdiv(B, tb) == 1 and B >= 256:
        tb = max(128, _round_down(pl.cdiv(B, 2), 128))
    return tb


def netflix_net(x, w1, b1, w2, b2):
    """Forward pass of NetflixNet.

    x:  (B, input_dim) float32
    w1: (input_dim, 64), b1: (64,)     (w1/w2 are stored (in, out), i.e. the
    w2: (64, 1),         b2: (1,)       transpose of PyTorch's fc.weight)
    returns (B, 1) float32
    """
    B, K = x.shape
    H = w1.shape[1]

    tb = _pick_batch_tile(B, K, H)
    num_tiles = pl.cdiv(B, tb)

    b1_2d = b1.reshape(1, H)
    w2_rows = jnp.broadcast_to(w2.reshape(1, H), (8, H))  # 8 identical rows
    b2_s = b2.reshape(1).astype(jnp.float32)

    # Scoped-VMEM limit: enough for the double-buffered x tile, the f32
    # intermediates and the resident weights, clamped to a v7x-safe ceiling.
    vmem_est = (2 * tb * K * 4 + tb * H * 4 + tb * 8 * 4 + 2 * tb * 4
                + (K * H + H + 8 * H) * 4 + (2 << 20))
    vmem_limit = int(min(max(vmem_est, 16 << 20), 48 << 20))

    out = pl.pallas_call(
        netflix_kernel,
        out_shape=jax.ShapeDtypeStruct((1, B), jnp.float32),
        grid=(num_tiles,),
        in_specs=[
            pl.BlockSpec((tb, K), lambda i: (i, 0)),            # x: batch-tiled
            pl.BlockSpec((K, H), lambda i: (0, 0)),             # w1: resident
            pl.BlockSpec((1, H), lambda i: (0, 0)),             # b1: resident
            pl.BlockSpec((8, H), lambda i: (0, 0)),             # w2 rows: resident
            pl.BlockSpec(memory_space=pltpu.MemorySpace.SMEM),  # b2 scalar
        ],
        out_specs=pl.BlockSpec((1, tb), lambda i: (0, i)),
        compiler_params=pltpu.CompilerParams(
            dimension_semantics=("parallel",),
            vmem_limit_bytes=vmem_limit,
        ),
    )(x, w1, b1_2d, w2_rows, b2_s)

    # Any undefined lanes from a partial last block (B % tb != 0) are sliced
    # off here -- keep this slice if the tiling ever changes.
    return out[0, :B].reshape(B, 1)


def init_params(key, input_dim, hidden=64):
    # Deterministic init (Kaiming-uniform-ish like PyTorch defaults; the exact
    # distribution does not matter for a synthetic kernel).
    k1, k2, k3, k4 = jax.random.split(key, 4)
    bound1 = 1.0 / jnp.sqrt(input_dim)
    bound2 = 1.0 / jnp.sqrt(hidden)
    w1 = jax.random.uniform(k1, (input_dim, hidden), jnp.float32, -bound1, bound1)
    b1 = jax.random.uniform(k2, (hidden,), jnp.float32, -bound1, bound1)
    w2 = jax.random.uniform(k3, (hidden, 1), jnp.float32, -bound2, bound2)
    b2 = jax.random.uniform(k4, (1,), jnp.float32, -bound2, bound2)
    return w1, b1, w2, b2


def _reference(x, w1, b1, w2, b2):
    return jax.nn.sigmoid(jnp.maximum(x @ w1 + b1, 0.0) @ w2 + b2)


if __name__ == "__main__":
    key = jax.random.PRNGKey(0)
    kx, kp, kx2 = jax.random.split(key, 3)

    input_dim = 32
    w1, b1, w2, b2 = init_params(kp, input_dim)

    # Small case: single full-array block.
    x = jax.random.normal(kx, (8, input_dim), jnp.float32)
    out = jax.block_until_ready(netflix_net(x, w1, b1, w2, b2))
    ref = _reference(x, w1, b1, w2, b2)
    assert out.shape == (8, 1)
    assert jnp.allclose(out, ref, atol=1e-5, rtol=1e-5), (
        float(jnp.max(jnp.abs(out - ref))))

    # Medium case: exercises multi-tile grid + masked partial last block
    # (no jnp.pad of x anywhere).
    x2 = jax.random.normal(kx2, (300, input_dim), jnp.float32)
    out2 = jax.block_until_ready(netflix_net(x2, w1, b1, w2, b2))
    ref2 = _reference(x2, w1, b1, w2, b2)
    assert out2.shape == (300, 1)
    assert jnp.allclose(out2, ref2, atol=1e-5, rtol=1e-5), (
        float(jnp.max(jnp.abs(out2 - ref2))))

    print("KERNEL_OK")
</pallas_src>

<mosaic_0001>
module attributes {stable_mosaic.version = 11 : i64} {
  func.func @netflix_kernel(%arg0: i32, %arg1: memref<8x32xf32, #tpu.memory_space<vmem>>, %arg2: memref<32x64xf32, #tpu.memory_space<vmem>>, %arg3: memref<1x64xf32, #tpu.memory_space<vmem>>, %arg4: memref<8x64xf32, #tpu.memory_space<vmem>>, %arg5: memref<1xf32, #tpu.memory_space<smem>>, %arg6: memref<1x8xf32, #tpu.memory_space<vmem>>) attributes {dimension_semantics = [#tpu.dimension_semantics<parallel>], iteration_bounds = array<i64: 1>, scalar_prefetch = 0 : i64, scratch_operands = 0 : i64, tpu.core_type = #tpu.core_type<tc>, window_params = [{transform_indices = @transform_0, window_bounds = array<i64: 8, 32>}, {pipeline_mode = #tpu.pipeline_mode<synchronous>, transform_indices = @transform_1, window_bounds = array<i64: 32, 64>}, {pipeline_mode = #tpu.pipeline_mode<synchronous>, transform_indices = @transform_2, window_bounds = array<i64: 1, 64>}, {pipeline_mode = #tpu.pipeline_mode<synchronous>, transform_indices = @transform_3, window_bounds = array<i64: 8, 64>}, {transform_indices = @transform_4, window_bounds = array<i64: 1>}, {transform_indices = @transform_5, window_bounds = array<i64: 1, 8>}]} {
    %c0 = arith.constant 0 : index
    %c0_0 = arith.constant 0 : index
    %0 = vector.load %arg1[%c0, %c0_0] : memref<8x32xf32, #tpu.memory_space<vmem>>, vector<8x32xf32>
    %c0_1 = arith.constant 0 : index
    %c0_2 = arith.constant 0 : index
    %1 = vector.load %arg2[%c0_1, %c0_2] : memref<32x64xf32, #tpu.memory_space<vmem>>, vector<32x64xf32>
    %cst = arith.constant dense<0.000000e+00> : vector<8x64xf32>
    %2 = tpu.matmul %0, %1, %cst {dimension_numbers = #tpu.dot_dimension_numbers<[1], [0], [0], [1], [0, 0, 1, 1], [], []>} : vector<8x32xf32>, vector<32x64xf32>, vector<8x64xf32> -> vector<8x64xf32>
    %c0_3 = arith.constant 0 : index
    %c0_4 = arith.constant 0 : index
    %3 = vector.load %arg3[%c0_3, %c0_4] : memref<1x64xf32, #tpu.memory_space<vmem>>, vector<1x64xf32>
    %4 = vector.broadcast %3 : vector<1x64xf32> to vector<8x64xf32>
    %5 = arith.addf %2, %4 : vector<8x64xf32>
    %cst_5 = arith.constant 0.000000e+00 : f32
    %6 = vector.broadcast %cst_5 : f32 to vector<8x64xf32>
    %7 = arith.maximumf %5, %6 : vector<8x64xf32>
    %c0_6 = arith.constant 0 : index
    %c0_7 = arith.constant 0 : index
    %8 = vector.load %arg4[%c0_6, %c0_7] : memref<8x64xf32, #tpu.memory_space<vmem>>, vector<8x64xf32>
    %cst_8 = arith.constant dense<0.000000e+00> : vector<8x8xf32>
    %9 = tpu.matmul %8, %7, %cst_8 {dimension_numbers = #tpu.dot_dimension_numbers<[1], [1], [0], [0], [0, 0, 1, 0], [], []>} : vector<8x64xf32>, vector<8x64xf32>, vector<8x8xf32> -> vector<8x8xf32>
    %10 = vector.extract_strided_slice %9 {offsets = [0, 0], sizes = [1, 8], strides = [1, 1]} : vector<8x8xf32> to vector<1x8xf32>
    %c0_9 = arith.constant 0 : index
    %11 = memref.load %arg5[%c0_9] : memref<1xf32, #tpu.memory_space<smem>>
    %12 = vector.broadcast %11 : f32 to vector<1x8xf32>
    %13 = arith.addf %10, %12 : vector<1x8xf32>
    %14 = arith.negf %13 : vector<1x8xf32>
    %15 = math.exp %14 : vector<1x8xf32>
    %cst_10 = arith.constant 1.000000e+00 : f32
    %16 = vector.broadcast %cst_10 : f32 to vector<1x8xf32>
    %17 = arith.addf %16, %15 : vector<1x8xf32>
    %18 = arith.divf %16, %17 : vector<1x8xf32>
    %c0_11 = arith.constant 0 : index
    %c0_12 = arith.constant 0 : index
    %19 = vector.load %arg6[%c0_11, %c0_12] : memref<1x8xf32, #tpu.memory_space<vmem>>, vector<1x8xf32>
    tpu.vector_store %arg6[%c0_11, %c0_12], %18 {strides = array<i32>} : memref<1x8xf32, #tpu.memory_space<vmem>>, vector<1x8xf32>,
    return
  }
  func.func @transform_0(%arg0: i32) -> (i32, i32) {
    %c0_i32 = arith.constant 0 : i32
    %c0_i32_0 = arith.constant 0 : i32
    return %arg0, %c0_i32 : i32, i32
  }
  func.func @transform_1(%arg0: i32) -> (i32, i32) {
    %c0_i32 = arith.constant 0 : i32
    %c0_i32_0 = arith.constant 0 : i32
    %c0_i32_1 = arith.constant 0 : i32
    return %c0_i32, %c0_i32_0 : i32, i32
  }
  func.func @transform_2(%arg0: i32) -> (i32, i32) {
    %c0_i32 = arith.constant 0 : i32
    %c0_i32_0 = arith.constant 0 : i32
    %c0_i32_1 = arith.constant 0 : i32
    return %c0_i32, %c0_i32_0 : i32, i32
  }
  func.func @transform_3(%arg0: i32) -> (i32, i32) {
    %c0_i32 = arith.constant 0 : i32
    %c0_i32_0 = arith.constant 0 : i32
    %c0_i32_1 = arith.constant 0 : i32
    return %c0_i32, %c0_i32_0 : i32, i32
  }
  func.func @transform_4(%arg0: i32) -> i32 {
    %c0_i32 = arith.constant 0 : i32
    %c0_i32_0 = arith.constant 0 : i32
    return %c0_i32 : i32
  }
  func.func @transform_5(%arg0: i32) -> (i32, i32) {
    %c0_i32 = arith.constant 0 : i32
    %c0_i32_0 = arith.constant 0 : i32
    return %c0_i32, %arg0 : i32, i32
  }
}

</mosaic_0001>

<bundles_post_ra>
// kernel: tpu_custom_call.1
= control target key start
LH: loop header
LB: loop body
LE: loop exit
PB: predicated region body
PF: predicated region fallthrough
CT: control target
= control target key end

     0   :  { %11 = vsyncpa [#allocation4], 0  ;;  %s340_s0 = inlined_call_operand.hbm [shape: f32[8,32], index: 0, kind: input, shape index: {}]   ;;  %s341_s1 = inlined_call_operand.hbm [shape: f32[32,64], index: 1, kind: input, shape index: {}]   ;;  %s342_s2 = inlined_call_operand.vmem [shape: f32[1,64], index: 2, kind: input, shape index: {}]   ;;  %s343_s3 = inlined_call_operand.hbm [shape: f32[8,64], index: 3, kind: input, shape index: {}]   ;;  %s344_s4 = inlined_call_operand.<no memory space> [shape: f32[1], index: 4, kind: input, shape index: {}]   ;;  %s345_s5 = inlined_call_operand.hbm [shape: f32[1,8], index: 5, kind: output, shape index: {}]  }
   0x1   :  { %12 = vsyncpa [#allocation7], 0  ;;  %s29_s20 = sshll.u32 %s341_s1, 4  ;;  %s30_s20 = int_to_ptr.hbm [resolvable:$true] %s29_s20 }
   0x2   :  { %13 = vsyncpa [#allocation5], 0  ;;  %s286_s21 = smov [#allocation6]   ;;  %s19_s25 = sshll.u32 %s340_s0, 4  ;;  %s20_s25 = int_to_ptr.hbm [resolvable:$true] %s19_s25 }
   0x3   :  { %s31_s22 = sshll.u32 %s286_s21, 4  ;;  %s287_s26 = smov 128   ;;  %s32_s22 = int_to_ptr.vmem [resolvable:$true] %s31_s22 }
   0x4   :  { %s288_s27 = smov 8   ;;  %s289_s28 = smov [#allocation3]  }
   0x5   :  { %37 = dma.hbm_to_vmem [thread:$0]  %s30_s20, 512, %s32_s22, [#allocation7], %s287_s26, %s287_s26, %s288_s27  }
   0x6   :  { %s21_s29 = sshll.u32 %s289_s28, 4  ;;  %s45_s7 = sshll.u32 %s343_s3, 4  ;;  %s22_s29 = int_to_ptr.vmem [resolvable:$true] %s21_s29  ;;  %s46_s7 = int_to_ptr.hbm [resolvable:$true] %s45_s7 }
   0x7   :  { %24 = dma.hbm_to_vmem [thread:$0]  %s20_s25, 128, %s22_s29, [#allocation4]  }
   0x8   :  { %s290_s1 = smov [#allocation8]  }
   0x9   :  { %s47_s8 = sshll.u32 %s290_s1, 4  ;;  %s48_s8 = int_to_ptr.vmem [resolvable:$true] %s47_s8 }
   0xa   :  { %50 = dma.hbm_to_vmem [thread:$0]  %s46_s7, 128, %s48_s8, [#allocation7]  }
   0xb   :  { %280 = dma.done.wait [#allocation4], 128  }
   0xc   :  { %281 = vsyncadd [#allocation4], 4294967168 }
   0xd   :  { %282 = dma.done.wait [#allocation7], 640  }
   0xe   :  { %283 = vsyncadd [#allocation7], 4294966656  ;;  %v69_v0 = vld [vmem:[#allocation6 + $0x18] sm:$0xff]  ;;  %v68_v1 = vld [vmem:[#allocation6 + $0x10] sm:$0xff]  ;;  %vm74_vm0 = vcmask 261120   ;;  %vm100_vm1 = vcmask 523264   ;;  %v128_v10 = vstv %s344_s4 }
   0xf   :  { %90 = vmatpush.msra.mxu0 %v69_v0  ;;  %v67_v2 = vld [vmem:[#allocation6 + $0x8] sm:$0xff]  ;;  %v66_v3 = vld [vmem:[#allocation6] sm:$0xff]  ;;  %v65_v4 = vld [vmem:[#allocation3] sm:$0xff]  ;;  %s158_s4 = sshll.u32 %s345_s5, 4  ;;  %vm149_vm5 = vcmask 57344   ;;  %s159_s4 = int_to_ptr.hbm [resolvable:$true] %s158_s4 }
  0x10   :  { %v179_v5 = vld [vmem:[%s342_s2] ss:$0 sm:$0xff]  ;;  %v99_v9 = vld [vmem:[#allocation8] sm:$0xff]  ;;  %s291_s2 = smov [#allocation9]  }
  0x11   :  { %91 = vmatpush.msra.mxu0 %v68_v1  ;;  %s156_s11 = sshll.u32 %s291_s2, 4  ;;  %s157_s11 = int_to_ptr.vmem [resolvable:$true] %s156_s11 }
  0x13   :  { %92 = vmatpush.msra.mxu0 %v67_v2 }
  0x15   :  { %93 = vmatpush.msra.mxu0 %v66_v3 }
  0x16   :  { %169 = vmatmul.msk.f32.vlgmr.msra.gmra.mxu0 %vm74_vm0, %v65_v4 }
  0x93   :  { %v95_v6 = vpop.f32.mrf.mxu0 }
  0x94   :  { %v96_v7 = vadd.f32 %v179_v5, %v95_v6 }
  0x96   :  { %v98_v8 = vmax.f32 %v96_v7, 0.0 }
  0x98   :  { %170 = vmatpush.xpose.msk.msra.mxu1 %vm100_vm1, %v98_v8 }
  0x9b   :  { %171 = vmatmul.msk.f32.vlgmr.msra.gmra.mxu1 %vm100_vm1, %v99_v9 }
 0x118   :  { %v124_v11 = vpop.f32.mrf.mxu1 }
 0x119   :  { %v129_v12 = vadd.f32 %v128_v10, %v124_v11 }
 0x11b   :  { %v172_v13 = vmul.f32 -1.442695, %v129_v12 }
 0x11d   :  { %180 = vpow2.f32 %v172_v13 }
 0x123   :  { %v181_v14 = vpop.eup %180 }
 0x124   :  { %v133_v15 = vadd.f32 1.0, %v181_v14 }
 0x126   :  { %182 = vrcp.f32 %v133_v15  ;;  %v145_v19 = vand.u32 2147483648, %v133_v15  ;;  %v143_v21 = vand.u32 2147483647, %v133_v15  ;;  %vm139_vm3 = vweird.f32 %v133_v15 }
 0x128   :  { %v146_v23 = vor.u32 1.1754944e-38, %v145_v19  ;;  %vm144_vm6 = vcmp.eq.f32.partialorder %v143_v21, 8.507059e+37 }
 0x12c   :  { %v183_v16 = vpop.eup %182 }
 0x12d   :  { %v135_v17 = vmul.f32 %v183_v16, %v133_v15  ;;  %vm140_vm2 = vweird.f32 %v183_v16 }
 0x12e   :  { %vm141_vm4 = vmor %vm139_vm3, %vm140_vm2 }
 0x12f   :  { %v136_v18 = vsub.f32 1.0, %v135_v17 }
 0x131   :  { %v137_v20 = vmul.f32 %v183_v16, %v136_v18 }
 0x133   :  { %v138_v22 = vadd.f32 %v183_v16, %v137_v20 }
 0x135   :  { %v142_v24 = vsel %vm141_vm4, %v183_v16, %v138_v22 }
 0x136   :  { %v147_v25 = vsel %vm144_vm6, %v146_v23, %v142_v24 }
 0x137   :  { %150 = vst.msk [vmem:[#allocation9] sm:$0x1] %vm149_vm5, %v147_v25 }
 0x138   :  { %161 = dma.vmem_to_hbm [thread:$0]  %s157_s11, 16, %s159_s4, [#allocation5]  }
 0x139   :  { %284 = dma.done.wait [#allocation5], 16  }
 0x13a   :  { %285 = vsyncadd [#allocation5], 4294967280 }
 0x13b   :  { %166 = vsyncpa [#allocation4], 1 }
 0x13c   :  { %167 = vsyncpa [#allocation7], 1 }
 0x13d   :  { %168 = vsyncpa [#allocation5], 1 }

</bundles_post_ra>
